<compile_context>
chip_gen: v5e
topology: v5e:2x2
jax: 0.10.0
libtpu: 0.0.40
codegen_flags: <defaults>
</compile_context>

<pallas_src>
import functools

import jax
import jax.numpy as jnp
from jax.experimental import pallas as pl
from jax.experimental.pallas import tpu as pltpu


# Per-block byte budget for the x / out tiles. With Pallas' default
# double-buffering (2 bufs in + 2 bufs out) the resident footprint is ~4x this,
# i.e. ~24 MiB — comfortably under the 48 MiB vmem limit we request below and
# under v7x's 64 MiB physical VMEM.
_BLOCK_BUDGET_BYTES = 6 * 1024 * 1024


def _choose_blocks(B, C, HW, itemsize):
    """Pick (Bblk, Cblk) so one (Bblk, Cblk, HW) tile fits the VMEM budget."""
    row_bytes = HW * itemsize
    img_bytes = C * row_bytes
    if img_bytes <= _BLOCK_BUDGET_BYTES:
        # Whole (C, HW) image fits: also pack multiple batch elements per step
        # so tiny problems run in very few grid steps.
        bblk = min(B, max(1, _BLOCK_BUDGET_BYTES // img_bytes))
        while B % bblk:  # largest divisor of B within budget
            bblk -= 1
        return bblk, C
    # Channel tiling. The second-to-last block dim must be a multiple of 8
    # (sublane tiling) or equal to the full C extent.
    cmax = max(1, _BLOCK_BUDGET_BYTES // row_bytes)
    for cand in range(min(C, cmax), 0, -1):
        if C % cand == 0 and cand % 8 == 0:
            return 1, cand
    # Fallback: whole channel dim per block (rare; only if C has no suitable
    # multiple-of-8 divisor that fits the budget).
    # TODO(synk): if a single (1, C, HW) f32 row set ever exceeds VMEM, the HW
    # axis would also need tiling with a two-pass / accumulated reduction.
    return 1, C


def _adverstyle_kernel(eps, x_ref, p_ref, o_ref):
    # x_ref: (Bblk, Cblk, HW)   p_ref: (Bblk, Cblk, 2)  [.., 0]=mu_adv [.., 1]=var_adv
    x = x_ref[...].astype(jnp.float32)
    hw = x.shape[-1]

    # Per-(batch, channel) spatial statistics. Two-pass (diff-based) variance
    # to avoid cancellation; unbiased divisor (N-1) to match torch.var.
    mu = jnp.mean(x, axis=-1, keepdims=True)                      # (Bblk, Cblk, 1)
    diff = x - mu
    var = jnp.sum(diff * diff, axis=-1, keepdims=True) * (1.0 / (hw - 1))

    p = p_ref[...].astype(jnp.float32)
    mu_adv = p[:, :, 0:1]                                         # (Bblk, Cblk, 1)
    var_adv = p[:, :, 1:2]                                        # (Bblk, Cblk, 1)

    sig = jnp.sqrt(var + eps)
    sig_adv = jnp.sqrt(var_adv + eps)

    # Fold normalization + re-affine into a per-channel scale/shift FMA.
    scale = (sig + sig_adv) * pl.reciprocal(sig)                  # per-channel only
    shift = mu + mu_adv
    o_ref[...] = (diff * scale + shift).astype(o_ref.dtype)


def adverstyle_forward(x, params, *, eps=1e-6):
    """Pallas forward of AdverStyleBlock (applied / 'training' path).

    x:      (B, C, H, W)
    params: (2, B, C)  -- params[0] = mu_adver, params[1] = var_adver
    """
    B, C, H, W = x.shape
    assert params.shape == (2, B, C)
    HW = H * W
    assert HW > 1, "unbiased variance needs H*W > 1"

    # Lane-dense layouts (cheap, contiguous reshapes / tiny transpose).
    x2 = x.reshape(B, C, HW)
    p2 = jnp.transpose(params, (1, 2, 0))            # (B, C, 2)

    Bblk, Cblk = _choose_blocks(B, C, HW, x.dtype.itemsize)
    grid = (B // Bblk, C // Cblk)

    kernel = functools.partial(_adverstyle_kernel, float(eps))

    out = pl.pallas_call(
        kernel,
        out_shape=jax.ShapeDtypeStruct((B, C, HW), x.dtype),
        grid_spec=pltpu.PrefetchScalarGridSpec(
            num_scalar_prefetch=0,
            grid=grid,
            in_specs=[
                pl.BlockSpec((Bblk, Cblk, HW), lambda b, c: (b, c, 0)),
                pl.BlockSpec((Bblk, Cblk, 2), lambda b, c: (b, c, 0)),
            ],
            out_specs=pl.BlockSpec((Bblk, Cblk, HW), lambda b, c: (b, c, 0)),
        ),
        compiler_params=pltpu.CompilerParams(
            dimension_semantics=("parallel", "parallel"),
            vmem_limit_bytes=48 * 1024 * 1024,
        ),
    )(x2, p2)

    return out.reshape(B, C, H, W)


def _reference(x, params, eps=1e-6):
    """Pure-JAX reference mirroring the PyTorch forward."""
    x = x.astype(jnp.float32)
    mu = jnp.mean(x, axis=(2, 3), keepdims=True)
    var = jnp.var(x, axis=(2, 3), keepdims=True, ddof=1)   # unbiased, like torch
    B, C = x.shape[0], x.shape[1]
    mu_adv = params[0].reshape(B, C, 1, 1)
    var_adv = params[1].reshape(B, C, 1, 1)
    sig = jnp.sqrt(var + eps)
    sig_adv = jnp.sqrt(var_adv + eps)
    x_normed = (x - mu) / sig
    return (sig + sig_adv) * x_normed + (mu + mu_adv)


if __name__ == "__main__":
    B, C, H, W = 2, 4, 16, 16
    key = jax.random.PRNGKey(0)
    kx, kp = jax.random.split(key)
    x = jax.random.normal(kx, (B, C, H, W), dtype=jnp.float32)

    # TODO(synk): the host-side `np.random.random() > prob` / eval-mode early
    # return is Python control flow outside the kernel; here we run the
    # applied (training) path deterministically.

    # Case 1: parameter init exactly as the module's __init__ (zeros).
    params0 = jnp.zeros((2, B, C), dtype=jnp.float32)
    out0 = jax.block_until_ready(adverstyle_forward(x, params0))
    ref0 = _reference(x, params0)
    assert out0.shape == x.shape and out0.dtype == x.dtype
    assert jnp.allclose(out0, ref0, atol=1e-5, rtol=1e-5)

    # Case 2: non-trivial adversarial params (var row kept >= 0 to avoid NaN,
    # matching the PyTorch original's implicit assumption).
    praw = 0.1 * jax.random.normal(kp, (2, B, C), dtype=jnp.float32)
    params1 = jnp.stack([praw[0], jnp.abs(praw[1])], axis=0)
    out1 = jax.block_until_ready(adverstyle_forward(x, params1))
    ref1 = _reference(x, params1)
    assert jnp.allclose(out1, ref1, atol=1e-5, rtol=1e-5)

    print("KERNEL_OK")
</pallas_src>

<mosaic_0001>
module attributes {stable_mosaic.version = 11 : i64} {
  func.func @_adverstyle_kernel(%arg0: i32, %arg1: i32, %arg2: memref<2x4x256xf32, #tpu.memory_space<vmem>>, %arg3: memref<2x4x2xf32, #tpu.memory_space<vmem>>, %arg4: memref<2x4x256xf32, #tpu.memory_space<vmem>>) attributes {dimension_semantics = [#tpu.dimension_semantics<parallel>, #tpu.dimension_semantics<parallel>], iteration_bounds = array<i64: 1, 1>, scalar_prefetch = 0 : i64, scratch_operands = 0 : i64, tpu.core_type = #tpu.core_type<tc>, window_params = [{transform_indices = @transform_0, window_bounds = array<i64: 2, 4, 256>}, {transform_indices = @transform_1, window_bounds = array<i64: 2, 4, 2>}, {transform_indices = @transform_2, window_bounds = array<i64: 2, 4, 256>}]} {
    %c0 = arith.constant 0 : index
    %c0_0 = arith.constant 0 : index
    %c0_1 = arith.constant 0 : index
    %0 = vector.load %arg2[%c0, %c0_0, %c0_1] : memref<2x4x256xf32, #tpu.memory_space<vmem>>, vector<2x4x256xf32>
    %cst = arith.constant dense<0.000000e+00> : vector<2x4xf32>
    %1 = vector.multi_reduction <add>, %0, %cst [2] : vector<2x4x256xf32> to vector<2x4xf32>
    %2 = vector.shape_cast %1 : vector<2x4xf32> to vector<2x4x1xf32>
    %cst_2 = arith.constant 2.560000e+02 : f32
    %3 = vector.broadcast %cst_2 : f32 to vector<2x4x1xf32>
    %4 = arith.divf %2, %3 : vector<2x4x1xf32>
    %5 = vector.broadcast %4 : vector<2x4x1xf32> to vector<2x4x256xf32>
    %6 = arith.subf %0, %5 : vector<2x4x256xf32>
    %7 = arith.mulf %6, %6 : vector<2x4x256xf32>
    %cst_3 = arith.constant dense<0.000000e+00> : vector<2x4xf32>
    %8 = vector.multi_reduction <add>, %7, %cst_3 [2] : vector<2x4x256xf32> to vector<2x4xf32>
    %9 = vector.shape_cast %8 : vector<2x4xf32> to vector<2x4x1xf32>
    %cst_4 = arith.constant 0.00392156886 : f32
    %10 = vector.broadcast %cst_4 : f32 to vector<2x4x1xf32>
    %11 = arith.mulf %9, %10 : vector<2x4x1xf32>
    %c0_5 = arith.constant 0 : index
    %c0_6 = arith.constant 0 : index
    %c0_7 = arith.constant 0 : index
    %12 = vector.load %arg3[%c0_5, %c0_6, %c0_7] : memref<2x4x2xf32, #tpu.memory_space<vmem>>, vector<2x4x2xf32>
    %13 = vector.extract_strided_slice %12 {offsets = [0, 0, 0], sizes = [2, 4, 1], strides = [1, 1, 1]} : vector<2x4x2xf32> to vector<2x4x1xf32>
    %14 = vector.extract_strided_slice %12 {offsets = [0, 0, 1], sizes = [2, 4, 1], strides = [1, 1, 1]} : vector<2x4x2xf32> to vector<2x4x1xf32>
    %cst_8 = arith.constant 9.99999997E-7 : f32
    %15 = vector.broadcast %cst_8 : f32 to vector<2x4x1xf32>
    %16 = arith.addf %11, %15 : vector<2x4x1xf32>
    %17 = math.sqrt %16 : vector<2x4x1xf32>
    %cst_9 = arith.constant 9.99999997E-7 : f32
    %18 = vector.broadcast %cst_9 : f32 to vector<2x4x1xf32>
    %19 = arith.addf %14, %18 : vector<2x4x1xf32>
    %20 = math.sqrt %19 : vector<2x4x1xf32>
    %21 = arith.addf %17, %20 : vector<2x4x1xf32>
    %22 = tpu.reciprocal %17 : vector<2x4x1xf32> -> vector<2x4x1xf32>
    %23 = arith.mulf %21, %22 : vector<2x4x1xf32>
    %24 = arith.addf %4, %13 : vector<2x4x1xf32>
    %25 = vector.broadcast %23 : vector<2x4x1xf32> to vector<2x4x256xf32>
    %26 = arith.mulf %6, %25 : vector<2x4x256xf32>
    %27 = vector.broadcast %24 : vector<2x4x1xf32> to vector<2x4x256xf32>
    %28 = arith.addf %26, %27 : vector<2x4x256xf32>
    %c0_10 = arith.constant 0 : index
    %c0_11 = arith.constant 0 : index
    %c0_12 = arith.constant 0 : index
    %29 = vector.load %arg4[%c0_10, %c0_11, %c0_12] : memref<2x4x256xf32, #tpu.memory_space<vmem>>, vector<2x4x256xf32>
    tpu.vector_store %arg4[%c0_10, %c0_11, %c0_12], %28 {strides = array<i32>} : memref<2x4x256xf32, #tpu.memory_space<vmem>>, vector<2x4x256xf32>,
    return
  }
  func.func @transform_0(%arg0: i32, %arg1: i32) -> (i32, i32, i32) {
    %c0_i32 = arith.constant 0 : i32
    %c0_i32_0 = arith.constant 0 : i32
    return %arg0, %arg1, %c0_i32 : i32, i32, i32
  }
  func.func @transform_1(%arg0: i32, %arg1: i32) -> (i32, i32, i32) {
    %c0_i32 = arith.constant 0 : i32
    %c0_i32_0 = arith.constant 0 : i32
    return %arg0, %arg1, %c0_i32 : i32, i32, i32
  }
  func.func @transform_2(%arg0: i32, %arg1: i32) -> (i32, i32, i32) {
    %c0_i32 = arith.constant 0 : i32
    %c0_i32_0 = arith.constant 0 : i32
    return %arg0, %arg1, %c0_i32 : i32, i32, i32
  }
}

</mosaic_0001>

<bundles_post_ra>
// kernel: tpu_custom_call.1
= control target key start
LH: loop header
LB: loop body
LE: loop exit
PB: predicated region body
PF: predicated region fallthrough
CT: control target
= control target key end

     0   :  { %7 = vsyncpa [#allocation3], 0  ;;  %s415_s0 = inlined_call_operand.hbm [shape: f32[2,4,256], index: 0, kind: input, shape index: {}]   ;;  %s416_s1 = inlined_call_operand.vmem [shape: f32[2,4,2], index: 1, kind: input, shape index: {}]   ;;  %s417_s2 = inlined_call_operand.hbm [shape: f32[2,4,256], index: 2, kind: output, shape index: {}]  }
   0x1   :  { %8 = vsyncpa [#allocation4], 0  ;;  %s13_s11 = sshll.u32 %s415_s0, 4  ;;  %s330_s12 = smov [#allocation2]   ;;  %s14_s11 = int_to_ptr.hbm [resolvable:$true] %s13_s11 }
   0x2   :  { %s15_s13 = sshll.u32 %s330_s12, 4  ;;  %s331_s14 = smov 128   ;;  %s16_s13 = int_to_ptr.vmem [resolvable:$true] %s15_s13 }
   0x3   :  { %s332_s15 = smov 8  }
   0x4   :  { %21 = dma.hbm_to_vmem [thread:$0]  %s14_s11, 256, %s16_s13, [#allocation3], %s331_s14, %s331_s14, %s332_s15  }
   0x5   :  { %326 = dma.done.wait [#allocation3], 256  }
   0x6   :  { %327 = vsyncadd [#allocation3], 4294967040  ;;  %v28_v0 = vld [vmem:[#allocation2] sm:$0xff]  ;;  %v29_v1 = vld [vmem:[#allocation2 + $0x8] sm:$0xff]  ;;  %vm43_vm0 = vcmask 1043456   ;;  %v333_v12 = vmov 0  }
   0x7   :  { %32 = vst [vmem:[#allocation1] ss:$2 sm:$0xff] %v28_v0  ;;  %262 = vset.pattern.permute.xlu0 %v333_v12  ;;  %263 = vset.pattern.permute.xlu1 %v333_v12  ;;  %v334_v13 = vmov 256.0   ;;  %v335_v19 = vmov 839922192   ;;  %v336_v50 = vmov 1  }
   0x8   :  { %36 = vst [vmem:[#allocation1 + $0x10] ss:$2 sm:$0xff] %v29_v1  ;;  %264 = vrcp.f32 %v334_v13  ;;  %v66_v20 = vunpack.c.l.s4 %v335_v19  ;;  %v104_v23 = vld [vmem:[%s416_s1] sm:$0xf]  ;;  %v105_v45 = vld [vmem:[%s416_s1 + $0x4] sm:$0xf]  ;;  %261 = vset.pattern.permute.xlu2 %v336_v50 }
   0x9   :  { %v385_v47 = vadd.f32 1e-06, %v104_v23  ;;  %v388_v52 = vadd.f32 1e-06, %v105_v45  ;;  %s337_s1 = smov [#allocation5]   ;;  %s240_s22 = sshll.u32 %s417_s2, 4  ;;  %s241_s22 = int_to_ptr.hbm [resolvable:$true] %s240_s22 }
   0xa   :  { %v363_v22 = vunpack.c.0.s8 %v66_v20  ;;  %s238_s19 = sshll.u32 %s337_s1, 4  ;;  %s239_s19 = int_to_ptr.vmem [resolvable:$true] %s238_s19 }
   0xb   :  { %266 = vrsqrt.f32 %v385_v47  ;;  %vm141_vm4 = vcmp.eq.f32.partialorder %v385_v47, inf  ;;  %vm143_vm7 = vcmp.eq.f32.partialorder %v385_v47, 0.0  ;;  %vm153_vm12 = vcmp.eq.f32.partialorder %v388_v52, inf }
   0xc   :  { %vm155_vm13 = vcmp.eq.f32.partialorder %v388_v52, 0.0 }
   0xe   :  { %v33_v2 = vld.sshfl [vmem:[#allocation1] sm:$0xff pattern:$0x75316420]  ;;  %v34_v3 = vld.sshfl [vmem:[#allocation1 + $0x8] sm:$0xff pattern:$0x75316420]  ;;  %v265_v14 = vpop.eup %264 }
   0xf   :  { %v44_v4 = vsel %vm43_vm0, %v33_v2, 0.0  ;;  %v45_v5 = vsel %vm43_vm0, %v34_v3, 0.0  ;;  %v37_v7 = vld.sshfl [vmem:[#allocation1 + $0x10] sm:$0xff pattern:$0x75316420]  ;;  %v55_v15 = vmul.f32 256.0, %v265_v14  ;;  %vm59_vm1 = vweird.f32 %v265_v14 }
  0x10   :  { %v46_v6 = vadd.f32 %v45_v5, %v44_v4  ;;  %v38_v8 = vld.sshfl [vmem:[#allocation1 + $0x18] sm:$0xff pattern:$0x75316420]  ;;  %v49_v9 = vsel %vm43_vm0, %v37_v7, 0.0 }
  0x11   :  { %v50_v10 = vsel %vm43_vm0, %v38_v8, 0.0  ;;  %v56_v16 = vsub.f32 1.0, %v55_v15  ;;  %v267_v53 = vpop.eup %266 }
  0x12   :  { %47 = vadd.xlane.f32.xlu0 %v46_v6  ;;  %v51_v11 = vadd.f32 %v50_v10, %v49_v9  ;;  %v135_v58 = vmul.f32 %v267_v53, %v385_v47 }
  0x13   :  { %v57_v17 = vmul.f32 %v265_v14, %v56_v16 }
  0x14   :  { %v136_v61 = vmul.f32 %v267_v53, %v135_v58 }
  0x15   :  { %v58_v18 = vadd.f32 %v265_v14, %v57_v17 }
  0x16   :  { %v137_v2 = vmul.f32 0.5, %v136_v61 }
  0x17   :  { %v60_v21 = vsel %vm59_vm1, %v265_v14, %v58_v18 }
  0x18   :  { %v138_v9 = vsub.f32 1.5, %v137_v2 }
  0x1a   :  { %52 = vadd.xlane.f32.xlu0 %v51_v11  ;;  %v139_v14 = vmul.f32 %v267_v53, %v138_v9 }
  0x1c   :  { %v140_v18 = vmul.f32 %v139_v14, %v385_v47 }
  0x85   :  { %v48_v24 = vpop.xlane.xlu0 %47 }
  0x86   :  { %v61_v25 = vmul.f32 %v60_v21, %v48_v24 }
  0x88   :  { %v68_v26 = vperm.slane %v61_v25, %v363_v22  ;;  %v190_v27 = vadd.f32 %v104_v23, %v61_v25 }
  0x8a   :  { %v369_v28 = vsub.f32 %v28_v0, %v68_v26  ;;  %214 = vperm.xlu0 %262, %v190_v27   ;;  %v144_v26 = vand.u32 2147483648, %v385_v47 }
  0x8c   :  { %v77_v29 = vmul.f32 %v369_v28, %v369_v28 }
  0x8d   :  { %v53_v30 = vpop.xlane.xlu0 %52 }
  0x8e   :  { %81 = vst [vmem:[#allocation1] ss:$2 sm:$0xff] %v77_v29  ;;  %v62_v31 = vmul.f32 %v60_v21, %v53_v30  ;;  %v142_v29 = vsel %vm141_vm4, %v385_v47, %v140_v18 }
  0x90   :  { %v72_v32 = vperm.slane %v62_v31, %v363_v22  ;;  %v191_v46 = vadd.f32 %v105_v45, %v62_v31 }
  0x92   :  { %v374_v33 = vsub.f32 %v29_v1, %v72_v32 }
  0x94   :  { %v78_v34 = vmul.f32 %v374_v33, %v374_v33 }
  0x95   :  { %v82_v35 = vld.sshfl [vmem:[#allocation1] sm:$0xff pattern:$0x75316420]  ;;  %v83_v36 = vld.sshfl [vmem:[#allocation1 + $0x8] sm:$0xff pattern:$0x75316420] }
  0x96   :  { %85 = vst [vmem:[#allocation1 + $0x10] ss:$2 sm:$0xff] %v78_v34  ;;  %v92_v37 = vsel %vm43_vm0, %v82_v35, 0.0  ;;  %v93_v38 = vsel %vm43_vm0, %v83_v36, 0.0  ;;  %v145_v36 = vsel %vm143_vm7, %v144_v26, %v142_v29 }
  0x97   :  { %v94_v39 = vadd.f32 %v93_v38, %v92_v37 }
  0x99   :  { %95 = vadd.xlane.f32.xlu1 %v94_v39 }
  0x9d   :  { %v86_v40 = vld.sshfl [vmem:[#allocation1 + $0x10] sm:$0xff pattern:$0x75316420]  ;;  %v87_v41 = vld.sshfl [vmem:[#allocation1 + $0x18] sm:$0xff pattern:$0x75316420] }
  0x9e   :  { %v97_v42 = vsel %vm43_vm0, %v86_v40, 0.0  ;;  %v98_v43 = vsel %vm43_vm0, %v87_v41, 0.0 }
  0x9f   :  { %v99_v44 = vadd.f32 %v98_v43, %v97_v42 }
  0xa1   :  { %100 = vadd.xlane.f32.xlu1 %v99_v44 }
  0xba   :  { %218 = vperm.xlu1 %263, %v191_v46   ;;  %v156_v46 = vand.u32 2147483648, %v388_v52 }
 0x10c   :  { %v96_v48 = vpop.xlane.xlu1 %95 }
 0x10d   :  { %v102_v49 = vmul.f32 0.003921569, %v96_v48 }
 0x10f   :  { %v106_v51 = vadd.f32 1e-06, %v102_v49 }
 0x111   :  { %268 = vrsqrt.f32 %v106_v51  ;;  %vm115_vm2 = vcmp.eq.f32.partialorder %v106_v51, inf  ;;  %v118_v8 = vand.u32 2147483648, %v106_v51  ;;  %vm117_vm3 = vcmp.eq.f32.partialorder %v106_v51, 0.0 }
 0x112   :  { %270 = vrsqrt.f32 %v388_v52 }
 0x114   :  { %v101_v54 = vpop.xlane.xlu1 %100 }
 0x115   :  { %v103_v55 = vmul.f32 0.003921569, %v101_v54 }
 0x117   :  { %v269_v56 = vpop.eup %268  ;;  %v107_v57 = vadd.f32 1e-06, %v103_v55 }
 0x118   :  { %v109_v59 = vmul.f32 %v269_v56, %v106_v51  ;;  %v271_v63 = vpop.eup %270 }
 0x119   :  { %272 = vrsqrt.f32 %v107_v57  ;;  %v147_v5 = vmul.f32 %v271_v63, %v388_v52  ;;  %vm127_vm5 = vcmp.eq.f32.partialorder %v107_v57, inf  ;;  %v130_v21 = vand.u32 2147483648, %v107_v57 }
 0x11a   :  { %v110_v60 = vmul.f32 %v269_v56, %v109_v59  ;;  %vm129_vm6 = vcmp.eq.f32.partialorder %v107_v57, 0.0 }
 0x11b   :  { %v148_v12 = vmul.f32 %v271_v63, %v147_v5 }
 0x11c   :  { %v111_v62 = vmul.f32 0.5, %v110_v60  ;;  %v215_v60 = vpop.permute.xlu0 %214 }
 0x11d   :  { %v149_v16 = vmul.f32 0.5, %v148_v12 }
 0x11e   :  { %v112_v0 = vsub.f32 1.5, %v111_v62  ;;  %v223_v62 = vperm.slane %v215_v60, %v363_v22 }
 0x11f   :  { %v273_v1 = vpop.eup %272  ;;  %v150_v23 = vsub.f32 1.5, %v149_v16 }
 0x120   :  { %v121_v3 = vmul.f32 %v273_v1, %v107_v57  ;;  %v113_v4 = vmul.f32 %v269_v56, %v112_v0 }
 0x121   :  { %v151_v32 = vmul.f32 %v271_v63, %v150_v23 }
 0x122   :  { %v114_v6 = vmul.f32 %v113_v4, %v106_v51  ;;  %v122_v7 = vmul.f32 %v273_v1, %v121_v3 }
 0x123   :  { %v152_v39 = vmul.f32 %v151_v32, %v388_v52 }
 0x124   :  { %v116_v10 = vsel %vm115_vm2, %v106_v51, %v114_v6  ;;  %v123_v11 = vmul.f32 0.5, %v122_v7 }
 0x125   :  { %v119_v13 = vsel %vm117_vm3, %v118_v8, %v116_v10  ;;  %v154_v47 = vsel %vm153_vm12, %v388_v52, %v152_v39 }
 0x126   :  { %274 = vrcp.f32 %v119_v13  ;;  %v124_v15 = vsub.f32 1.5, %v123_v11  ;;  %v171_v31 = vand.u32 2147483648, %v119_v13  ;;  %v169_v35 = vand.u32 2147483647, %v119_v13 }
 0x127   :  { %vm165_vm9 = vweird.f32 %v119_v13  ;;  %v158_v41 = vadd.f32 %v145_v36, %v119_v13  ;;  %v157_v53 = vsel %vm155_vm13, %v156_v46, %v154_v47 }
 0x128   :  { %v125_v17 = vmul.f32 %v273_v1, %v124_v15  ;;  %v172_v38 = vor.u32 1.1754944e-38, %v171_v31  ;;  %vm170_vm11 = vcmp.eq.f32.partialorder %v169_v35, 8.507059e+37 }
 0x12a   :  { %v126_v19 = vmul.f32 %v125_v17, %v107_v57 }
 0x12c   :  { %v275_v20 = vpop.eup %274  ;;  %v128_v25 = vsel %vm127_vm5, %v107_v57, %v126_v19  ;;  %v219_v1 = vpop.permute.xlu1 %218 }
 0x12d   :  { %v161_v24 = vmul.f32 %v275_v20, %v119_v13  ;;  %v131_v27 = vsel %vm129_vm6, %v130_v21, %v128_v25  ;;  %vm166_vm8 = vweird.f32 %v275_v20  ;;  %v227_v4 = vperm.slane %v219_v1, %v363_v22 }
 0x12e   :  { %276 = vrcp.f32 %v131_v27  ;;  %vm167_vm10 = vmor %vm165_vm9, %vm166_vm8  ;;  %v185_v49 = vand.u32 2147483648, %v131_v27  ;;  %v183_v51 = vand.u32 2147483647, %v131_v27  ;;  %vm179_vm15 = vweird.f32 %v131_v27 }
 0x12f   :  { %v162_v30 = vsub.f32 1.0, %v161_v24  ;;  %v159_v56 = vadd.f32 %v157_v53, %v131_v27 }
 0x130   :  { %v186_v55 = vor.u32 1.1754944e-38, %v185_v49  ;;  %vm184_vm1 = vcmp.eq.f32.partialorder %v183_v51, 8.507059e+37 }
 0x131   :  { %v163_v34 = vmul.f32 %v275_v20, %v162_v30 }
 0x133   :  { %v164_v37 = vadd.f32 %v275_v20, %v163_v34 }
 0x134   :  { %v277_v40 = vpop.eup %276 }
 0x135   :  { %v168_v42 = vsel %vm167_vm10, %v275_v20, %v164_v37  ;;  %v175_v44 = vmul.f32 %v277_v40, %v131_v27  ;;  %vm180_vm14 = vweird.f32 %v277_v40 }
 0x136   :  { %v173_v43 = vsel %vm170_vm11, %v172_v38, %v168_v42  ;;  %vm181_vm0 = vmor %vm179_vm15, %vm180_vm14 }
 0x137   :  { %v188_v45 = vmul.f32 %v173_v43, %v158_v41  ;;  %v176_v48 = vsub.f32 1.0, %v175_v44 }
 0x139   :  { %194 = vperm.xlu2 %261, %v188_v45   ;;  %v177_v50 = vmul.f32 %v277_v40, %v176_v48 }
 0x13b   :  { %v178_v54 = vadd.f32 %v277_v40, %v177_v50 }
 0x13d   :  { %v182_v57 = vsel %vm181_vm0, %v277_v40, %v178_v54 }
 0x13e   :  { %v187_v58 = vsel %vm184_vm1, %v186_v55, %v182_v57 }
 0x13f   :  { %v189_v59 = vmul.f32 %v187_v58, %v159_v56 }
 0x141   :  { %198 = vperm.xlu2 %261, %v189_v59  }
 0x193   :  { %v195_v61 = vpop.permute.xlu2 %194 }
 0x194   :  { %v203_v52 = vperm.slane %v195_v61, %v363_v22 }
 0x196   :  { %v210_v63 = vmul.f32 %v203_v52, %v369_v28 }
 0x198   :  { %v230_v0 = vadd.f32 %v223_v62, %v210_v63 }
 0x19a   :  { %232 = vst [vmem:[#allocation5] sm:$0xff] %v230_v0 }
 0x19b   :  { %v199_v2 = vpop.permute.xlu2 %198 }
 0x19c   :  { %v207_v3 = vperm.slane %v199_v2, %v363_v22 }
 0x19e   :  { %v211_v5 = vmul.f32 %v207_v3, %v374_v33 }
 0x1a0   :  { %v231_v6 = vadd.f32 %v227_v4, %v211_v5 }
 0x1a2   :  { %233 = vst [vmem:[#allocation5 + $0x8] sm:$0xff] %v231_v6 }
 0x1a3   :  { %246 = dma.vmem_to_hbm [thread:$0]  %s239_s19, 256, %s241_s22, [#allocation4], %s331_s14, %s331_s14, %s332_s15  }
 0x1a4   :  { %328 = dma.done.wait [#allocation4], 256  }
 0x1a5   :  { %329 = vsyncadd [#allocation4], 4294967040 }
 0x1a6   :  { %251 = vsyncpa [#allocation3], 1 }
 0x1a7   :  { %252 = vsyncpa [#allocation4], 1 }

</bundles_post_ra>
